<compile_context>
chip_gen: v6e
topology: v6e:2x2x1
jax: 0.10.0
libtpu: 0.0.40
codegen_flags: <defaults>
</compile_context>

<pallas_src>
import functools
import math

import jax
import jax.numpy as jnp
from jax import lax
from jax.experimental import pallas as pl
from jax.experimental.pallas import tpu as pltpu


# rows of the consolidated (6, D) f32 "small vectors" operand
_BO, _LN1G, _LN1B, _B2, _LN2G, _LN2B = range(6)


def _layer_norm(h, gamma, beta, eps=1e-5):
    mu = jnp.mean(h, axis=-1, keepdims=True)
    var = jnp.mean((h - mu) ** 2, axis=-1, keepdims=True)
    return (h - mu) * lax.rsqrt(var + eps) * gamma + beta


def encoder_block_kernel(
    x_ref, bias_ref,
    wqkv_ref, bqkv_ref, wo_ref, w1_ref, b1_ref, w2_ref, vec_ref,
    out_ref,
    qkv_ref, ctx_ref,
    *, num_heads, block_batch,
):
    BT = block_batch
    _, S, D = x_ref.shape
    M = BT * S
    H = num_heads
    dk = D // H

    x_bf = x_ref[...].reshape(M, D)                 # bf16 activations
    x_f32 = x_bf.astype(jnp.float32)                # residual path in f32

    # ---- fused QKV projection (1/sqrt(dk) already folded into Q weights) ----
    qkv = jnp.dot(x_bf, wqkv_ref[...], preferred_element_type=jnp.float32)
    qkv_ref[...] = (qkv + bqkv_ref[...]).astype(jnp.bfloat16)

    # ---- attention ----
    # Per-(batch-row, head) 2-D dots with *static* ref slices into the bf16
    # QKV scratch; each head's context is stored into a static column slice
    # of the bf16 ctx scratch (no lane-axis concatenates, no big f32 qkv
    # value slicing, per-head values die at the store).
    # TODO(synk): attention dropout (p=0.1) is identity in eval mode; training
    # dropout would need pltpu.prng_seed / prng_random_bits masking.
    # TODO(synk): on v6e/v7x, batch the H per-head dots into one
    # lax.dot_general with a head batch dim (one (H, S, dk) relayout per step)
    # to fill the 256-wide MXU; kept per-head here for lowering robustness.
    # TODO(synk): for S >= ~1k add a flash-style KV inner loop so the (S, S)
    # score tile never fully materializes (v7x 64 MiB VMEM).
    for b in range(BT):
        r0, r1 = b * S, (b + 1) * S
        bias_b = bias_ref[b].astype(jnp.float32)    # (S, S) additive mask
        for h in range(H):
            c0, c1 = h * dk, (h + 1) * dk
            qh = qkv_ref[r0:r1, c0:c1]
            kh = qkv_ref[r0:r1, D + c0:D + c1]
            vh = qkv_ref[r0:r1, 2 * D + c0:2 * D + c1]
            s = lax.dot_general(qh, kh, (((1,), (1,)), ((), ())),
                                preferred_element_type=jnp.float32)
            s = s + bias_b
            m = jnp.max(s, axis=-1, keepdims=True)
            p = jnp.exp(s - m)                      # unnormalised probs (f32)
            denom = jnp.sum(p, axis=-1, keepdims=True)
            ctx_h = jnp.dot(p.astype(jnp.bfloat16), vh,
                            preferred_element_type=jnp.float32)
            ctx_h = ctx_h * pl.reciprocal(denom, approx=True)
            ctx_ref[r0:r1, c0:c1] = ctx_h.astype(jnp.bfloat16)

    bo = vec_ref[_BO:_BO + 1, :]
    ln1_g = vec_ref[_LN1G:_LN1G + 1, :]
    ln1_b = vec_ref[_LN1B:_LN1B + 1, :]
    b2 = vec_ref[_B2:_B2 + 1, :]
    ln2_g = vec_ref[_LN2G:_LN2G + 1, :]
    ln2_b = vec_ref[_LN2B:_LN2B + 1, :]

    # ---- output projection + LN1 + residual ----
    ctx = ctx_ref[...]                              # (M, D) bf16
    attn_out = jnp.dot(ctx, wo_ref[...],
                       preferred_element_type=jnp.float32) + bo
    cat_out = _layer_norm(attn_out, ln1_g, ln1_b) + x_f32

    # ---- feed-forward with ELU (f32 elementwise, bf16 matmuls) ----
    h1 = jnp.dot(cat_out.astype(jnp.bfloat16), w1_ref[...],
                 preferred_element_type=jnp.float32) + b1_ref[...]
    h1 = jnp.where(h1 > 0, h1, jnp.exp(jnp.minimum(h1, 0.0)) - 1.0)   # ELU
    h2 = jnp.dot(h1.astype(jnp.bfloat16), w2_ref[...],
                 preferred_element_type=jnp.float32) + b2

    # ---- LN2 + residual ----
    out = _layer_norm(h2, ln2_g, ln2_b) + cat_out
    out_ref[...] = out.reshape(BT, S, D)


def encoder_blocks_forward(x, mask, params, *, num_heads, block_batch=None):
    B, S, D = x.shape
    FF = params['w1'].shape[1]
    dk = D // num_heads
    scale = 1.0 / math.sqrt(dk)

    # Fold enough batch rows into one grid step to target M ~ 256 matmul rows
    # (fills the 256-wide MXU on v6e/v7x), but keep >= 2 grid steps when the
    # batch allows so the 'parallel' axis can shard across v7x's two cores.
    if block_batch is None:
        bt = max(1, min(B, max(1, 256 // S)))
        if B >= 2:
            bt = min(bt, B // 2)
        bt = max(bt, 1)
        while B % bt:
            bt -= 1
        block_batch = bt
    BT = block_batch
    assert B % BT == 0

    # 1/sqrt(dk) folded into the Q weights/bias in f32 *before* the bf16 cast
    # (one bf16 rounding either way), removing the per-score multiply.
    wq = params['wq'] * scale
    bq = params['bq'] * scale
    wqkv = jnp.concatenate([wq, params['wk'], params['wv']],
                           axis=1).astype(jnp.bfloat16)            # (D, 3D)
    bqkv = jnp.concatenate([bq, params['bk'], params['bv']],
                           axis=1).astype(jnp.float32)             # (1, 3D)
    wo = params['wo'].astype(jnp.bfloat16)
    w1 = params['w1'].astype(jnp.bfloat16)
    w2 = params['w2'].astype(jnp.bfloat16)
    b1 = params['b1'].astype(jnp.float32)
    vecs = jnp.concatenate(
        [params['bo'], params['ln1_g'], params['ln1_b'],
         params['b2'], params['ln2_g'], params['ln2_b']], axis=0
    ).astype(jnp.float32)                                          # (6, D)

    # Additive attention-mask bias, computed once outside the kernel and
    # streamed in bf16 (halves its DMA + VMEM footprint).
    mask_bias = jnp.where(mask[:, 0] == 0, -1e9, 0.0).astype(jnp.bfloat16)

    # Activations streamed in bf16 (matmuls are bf16 anyway; residual/LN math
    # is done in f32 inside the kernel).
    x_bf = x.astype(jnp.bfloat16)

    weights = (wqkv, bqkv, wo, w1, b1, w2, vecs)

    def _const_map(ndim):
        return lambda bt_idx: (0,) * ndim

    def _weight_spec(arr):
        # Grid-invariant weights: single-buffer to halve their VMEM footprint
        # (the block index never changes, so no pipelining is lost).
        try:
            return pl.BlockSpec(arr.shape, _const_map(arr.ndim),
                                pipeline_mode=pl.Buffered(1))
        except (TypeError, ValueError):
            return pl.BlockSpec(arr.shape, _const_map(arr.ndim))

    weight_specs = [_weight_spec(w) for w in weights]

    kernel = functools.partial(encoder_block_kernel,
                               num_heads=num_heads, block_batch=BT)

    H = num_heads
    flops = (2 * B * S * D * (3 * D)        # fused QKV projection
             + 4 * B * S * S * D            # scores + p@V (all heads)
             + 2 * B * S * D * D            # output projection
             + 4 * B * S * D * FF)          # FFN (both matmuls)
    transcendentals = B * H * S * S + B * S * FF + B * H * S
    bytes_accessed = (B * S * D * (2 + 4) + B * S * S * 2
                      + 2 * (3 * D * D + D * D + 2 * D * FF)
                      + 4 * (3 * D + FF + 6 * D))

    # VMEM budget derived from the actual part (3/4 of capacity, <= 96 MiB):
    # ~48 MiB on v7x (64 MiB parts), 96 MiB on v5e/v6e (128 MiB parts).
    try:
        vmem_cap = pltpu.get_tpu_info().vmem_capacity_bytes
    except Exception:
        vmem_cap = 128 * 1024 * 1024
    vmem_limit = max(32 * 1024 * 1024,
                     min(96 * 1024 * 1024, (vmem_cap * 3) // 4))

    return pl.pallas_call(
        kernel,
        out_shape=jax.ShapeDtypeStruct((B, S, D), jnp.float32),
        grid_spec=pltpu.PrefetchScalarGridSpec(
            num_scalar_prefetch=0,
            grid=(B // BT,),
            in_specs=[
                pl.BlockSpec((BT, S, D), lambda bt: (bt, 0, 0)),
                pl.BlockSpec((BT, S, S), lambda bt: (bt, 0, 0)),
            ] + weight_specs,
            out_specs=pl.BlockSpec((BT, S, D), lambda bt: (bt, 0, 0)),
            scratch_shapes=[
                pltpu.VMEM((BT * S, 3 * D), jnp.bfloat16),   # QKV scratch
                pltpu.VMEM((BT * S, D), jnp.bfloat16),       # ctx scratch
            ],
        ),
        compiler_params=pltpu.CompilerParams(
            dimension_semantics=("parallel",),
            vmem_limit_bytes=vmem_limit),
        cost_estimate=pl.CostEstimate(
            flops=flops, transcendentals=transcendentals,
            bytes_accessed=bytes_accessed),
    )(x_bf, mask_bias, *weights)


# ---------------- pure-JAX reference (mirrors the PyTorch forward) ----------
def reference_forward(x, mask, params, *, num_heads):
    B, S, D = x.shape
    d_k = D // num_heads

    def lin(h, w, b):
        return h @ w + b

    q = lin(x, params['wq'], params['bq']).reshape(B, S, num_heads, d_k).transpose(0, 2, 1, 3)
    k = lin(x, params['wk'], params['bk']).reshape(B, S, num_heads, d_k).transpose(0, 2, 1, 3)
    v = lin(x, params['wv'], params['bv']).reshape(B, S, num_heads, d_k).transpose(0, 2, 1, 3)

    scores = jnp.einsum('bhqd,bhkd->bhqk', q, k) / math.sqrt(d_k)
    scores = jnp.where(mask == 0, -1e9, scores)
    p = jax.nn.softmax(scores, axis=-1)
    ctx = jnp.einsum('bhqk,bhkd->bhqd', p, v).transpose(0, 2, 1, 3).reshape(B, S, D)
    attn_out = lin(ctx, params['wo'], params['bo'])

    def ln(h, g, b):
        mu = jnp.mean(h, -1, keepdims=True)
        var = jnp.mean((h - mu) ** 2, -1, keepdims=True)
        return (h - mu) / jnp.sqrt(var + 1e-5) * g + b

    cat_out = ln(attn_out, params['ln1_g'], params['ln1_b']) + x
    h1 = lin(cat_out, params['w1'], params['b1'])
    h1 = jnp.where(h1 > 0, h1, jnp.exp(h1) - 1.0)
    h2 = lin(h1, params['w2'], params['b2'])
    return ln(h2, params['ln2_g'], params['ln2_b']) + cat_out


def make_params(key, hidden_dim):
    D = hidden_dim
    ks = jax.random.split(key, 8)
    s = 0.05

    def w(k, shape):
        return (jax.random.normal(k, shape, jnp.float32) * s)

    return {
        'wq': w(ks[0], (D, D)),       'bq': jnp.zeros((1, D), jnp.float32),
        'wk': w(ks[1], (D, D)),       'bk': jnp.zeros((1, D), jnp.float32),
        'wv': w(ks[2], (D, D)),       'bv': jnp.zeros((1, D), jnp.float32),
        'wo': w(ks[3], (D, D)),       'bo': jnp.zeros((1, D), jnp.float32),
        'ln1_g': jnp.ones((1, D), jnp.float32),
        'ln1_b': jnp.zeros((1, D), jnp.float32),
        'w1': w(ks[4], (D, 4 * D)),   'b1': jnp.zeros((1, 4 * D), jnp.float32),
        'w2': w(ks[5], (4 * D, D)),   'b2': jnp.zeros((1, D), jnp.float32),
        'ln2_g': jnp.ones((1, D), jnp.float32),
        'ln2_b': jnp.zeros((1, D), jnp.float32),
    }


if __name__ == "__main__":
    B, S, D, H = 2, 8, 32, 4          # batch, seq, hidden_dim, multi_head

    key = jax.random.PRNGKey(0)
    kx, kp = jax.random.split(key)

    x = jax.random.normal(kx, (B, S, D), jnp.float32)

    # padding-style mask: last 2 key positions are masked out
    valid = (jnp.arange(S) < S - 2).astype(jnp.int32)            # (S,)
    mask = jnp.broadcast_to(valid[None, None, None, :], (B, 1, S, S)).astype(jnp.int32)

    params = make_params(kp, D)

    out = encoder_blocks_forward(x, mask, params, num_heads=H)
    out = jax.block_until_ready(out)

    ref = reference_forward(x, mask, params, num_heads=H)
    assert out.shape == (B, S, D)
    # bf16 activations/weights on the MXU + approximate softmax reciprocal vs.
    # an all-f32 reference -> relaxed tolerance.
    assert jnp.allclose(out, ref, atol=5e-2, rtol=5e-2), "mismatch vs reference"

    print("KERNEL_OK")
</pallas_src>

<mosaic_0001>
module attributes {stable_mosaic.version = 11 : i64} {
  func.func @encoder_block_kernel(%arg0: i32, %arg1: memref<1x8x32xbf16, #tpu.memory_space<vmem>>, %arg2: memref<1x8x8xbf16, #tpu.memory_space<vmem>>, %arg3: memref<32x96xbf16, #tpu.memory_space<vmem>>, %arg4: memref<1x96xf32, #tpu.memory_space<vmem>>, %arg5: memref<32x32xbf16, #tpu.memory_space<vmem>>, %arg6: memref<32x128xbf16, #tpu.memory_space<vmem>>, %arg7: memref<1x128xf32, #tpu.memory_space<vmem>>, %arg8: memref<128x32xbf16, #tpu.memory_space<vmem>>, %arg9: memref<6x32xf32, #tpu.memory_space<vmem>>, %arg10: memref<1x8x32xf32, #tpu.memory_space<vmem>>, %arg11: memref<8x96xbf16, #tpu.memory_space<vmem>>, %arg12: memref<8x32xbf16, #tpu.memory_space<vmem>>) attributes {dimension_semantics = [#tpu.dimension_semantics<parallel>], iteration_bounds = array<i64: 2>, scalar_prefetch = 0 : i64, scratch_operands = 2 : i64, tpu.core_type = #tpu.core_type<tc>, window_params = [{transform_indices = @transform_0, window_bounds = array<i64: 1, 8, 32>}, {transform_indices = @transform_1, window_bounds = array<i64: 1, 8, 8>}, {pipeline_mode = #tpu.pipeline_mode<synchronous>, transform_indices = @transform_2, window_bounds = array<i64: 32, 96>}, {pipeline_mode = #tpu.pipeline_mode<synchronous>, transform_indices = @transform_3, window_bounds = array<i64: 1, 96>}, {pipeline_mode = #tpu.pipeline_mode<synchronous>, transform_indices = @transform_4, window_bounds = array<i64: 32, 32>}, {pipeline_mode = #tpu.pipeline_mode<synchronous>, transform_indices = @transform_5, window_bounds = array<i64: 32, 128>}, {pipeline_mode = #tpu.pipeline_mode<synchronous>, transform_indices = @transform_6, window_bounds = array<i64: 1, 128>}, {pipeline_mode = #tpu.pipeline_mode<synchronous>, transform_indices = @transform_7, window_bounds = array<i64: 128, 32>}, {pipeline_mode = #tpu.pipeline_mode<synchronous>, transform_indices = @transform_8, window_bounds = array<i64: 6, 32>}, {transform_indices = @transform_9, window_bounds = array<i64: 1, 8, 32>}]} {
    %c0 = arith.constant 0 : index
    %c0_0 = arith.constant 0 : index
    %c0_1 = arith.constant 0 : index
    %0 = vector.load %arg1[%c0, %c0_0, %c0_1] : memref<1x8x32xbf16, #tpu.memory_space<vmem>>, vector<1x8x32xbf16>
    %1 = vector.shape_cast %0 : vector<1x8x32xbf16> to vector<8x32xbf16>
    %2 = arith.extf %1 : vector<8x32xbf16> to vector<8x32xf32>
    %c0_2 = arith.constant 0 : index
    %c0_3 = arith.constant 0 : index
    %3 = vector.load %arg3[%c0_2, %c0_3] : memref<32x96xbf16, #tpu.memory_space<vmem>>, vector<32x96xbf16>
    %cst = arith.constant dense<0.000000e+00> : vector<8x96xf32>
    %4 = tpu.matmul %1, %3, %cst {dimension_numbers = #tpu.dot_dimension_numbers<[1], [0], [0], [1], [0, 0, 1, 1], [], []>} : vector<8x32xbf16>, vector<32x96xbf16>, vector<8x96xf32> -> vector<8x96xf32>
    %c0_4 = arith.constant 0 : index
    %c0_5 = arith.constant 0 : index
    %5 = vector.load %arg4[%c0_4, %c0_5] : memref<1x96xf32, #tpu.memory_space<vmem>>, vector<1x96xf32>
    %6 = vector.broadcast %5 : vector<1x96xf32> to vector<8x96xf32>
    %7 = arith.addf %4, %6 : vector<8x96xf32>
    %8 = arith.truncf %7 : vector<8x96xf32> to vector<8x96xbf16>
    %c0_6 = arith.constant 0 : index
    %c0_7 = arith.constant 0 : index
    %9 = vector.load %arg11[%c0_6, %c0_7] : memref<8x96xbf16, #tpu.memory_space<vmem>>, vector<8x96xbf16>
    tpu.vector_store %arg11[%c0_6, %c0_7], %8 {strides = array<i32>} : memref<8x96xbf16, #tpu.memory_space<vmem>>, vector<8x96xbf16>,
    %c0_8 = arith.constant 0 : index
    %c0_9 = arith.constant 0 : index
    %c0_10 = arith.constant 0 : index
    %10 = vector.load %arg2[%c0_8, %c0_9, %c0_10] : memref<1x8x8xbf16, #tpu.memory_space<vmem>>, vector<1x8x8xbf16>
    %11 = vector.shape_cast %10 : vector<1x8x8xbf16> to vector<8x8xbf16>
    %12 = arith.extf %11 : vector<8x8xbf16> to vector<8x8xf32>
    %c0_11 = arith.constant 0 : index
    %c0_12 = arith.constant 0 : index
    %13 = vector.load %arg11[%c0_11, %c0_12] : memref<8x96xbf16, #tpu.memory_space<vmem>>, vector<8x8xbf16>
    %c0_13 = arith.constant 0 : index
    %c32 = arith.constant 32 : index
    %14 = vector.load %arg11[%c0_13, %c32] : memref<8x96xbf16, #tpu.memory_space<vmem>>, vector<8x8xbf16>
    %c0_14 = arith.constant 0 : index
    %c64 = arith.constant 64 : index
    %15 = vector.load %arg11[%c0_14, %c64] : memref<8x96xbf16, #tpu.memory_space<vmem>>, vector<8x8xbf16>
    %cst_15 = arith.constant dense<0.000000e+00> : vector<8x8xf32>
    %16 = tpu.matmul %13, %14, %cst_15 {dimension_numbers = #tpu.dot_dimension_numbers<[1], [1], [0], [0], [0, 0, 1, 0], [], []>} : vector<8x8xbf16>, vector<8x8xbf16>, vector<8x8xf32> -> vector<8x8xf32>
    %17 = arith.addf %16, %12 : vector<8x8xf32>
    %cst_16 = arith.constant dense<0xFF800000> : vector<8xf32>
    %18 = vector.multi_reduction <maximumf>, %17, %cst_16 [1] : vector<8x8xf32> to vector<8xf32>
    %19 = vector.shape_cast %18 : vector<8xf32> to vector<8x1xf32>
    %20 = vector.broadcast %19 : vector<8x1xf32> to vector<8x8xf32>
    %21 = arith.subf %17, %20 : vector<8x8xf32>
    %22 = math.exp %21 : vector<8x8xf32>
    %cst_17 = arith.constant dense<0.000000e+00> : vector<8xf32>
    %23 = vector.multi_reduction <add>, %22, %cst_17 [1] : vector<8x8xf32> to vector<8xf32>
    %24 = vector.shape_cast %23 : vector<8xf32> to vector<8x1xf32>
    %25 = arith.truncf %22 : vector<8x8xf32> to vector<8x8xbf16>
    %cst_18 = arith.constant dense<0.000000e+00> : vector<8x8xf32>
    %26 = tpu.matmul %25, %15, %cst_18 {dimension_numbers = #tpu.dot_dimension_numbers<[1], [0], [0], [1], [0, 0, 1, 1], [], []>} : vector<8x8xbf16>, vector<8x8xbf16>, vector<8x8xf32> -> vector<8x8xf32>
    %27 = tpu.reciprocal %24 {approx = true} : vector<8x1xf32> -> vector<8x1xf32>
    %28 = vector.broadcast %27 : vector<8x1xf32> to vector<8x8xf32>
    %29 = arith.mulf %26, %28 : vector<8x8xf32>
    %30 = arith.truncf %29 : vector<8x8xf32> to vector<8x8xbf16>
    %c0_19 = arith.constant 0 : index
    %c0_20 = arith.constant 0 : index
    %31 = vector.load %arg12[%c0_19, %c0_20] : memref<8x32xbf16, #tpu.memory_space<vmem>>, vector<8x8xbf16>
    tpu.vector_store %arg12[%c0_19, %c0_20], %30 {strides = array<i32>} : memref<8x32xbf16, #tpu.memory_space<vmem>>, vector<8x8xbf16>,
    %c0_21 = arith.constant 0 : index
    %c8 = arith.constant 8 : index
    %32 = vector.load %arg11[%c0_21, %c8] : memref<8x96xbf16, #tpu.memory_space<vmem>>, vector<8x8xbf16>
    %c0_22 = arith.constant 0 : index
    %c40 = arith.constant 40 : index
    %33 = vector.load %arg11[%c0_22, %c40] : memref<8x96xbf16, #tpu.memory_space<vmem>>, vector<8x8xbf16>
    %c0_23 = arith.constant 0 : index
    %c72 = arith.constant 72 : index
    %34 = vector.load %arg11[%c0_23, %c72] : memref<8x96xbf16, #tpu.memory_space<vmem>>, vector<8x8xbf16>
    %cst_24 = arith.constant dense<0.000000e+00> : vector<8x8xf32>
    %35 = tpu.matmul %32, %33, %cst_24 {dimension_numbers = #tpu.dot_dimension_numbers<[1], [1], [0], [0], [0, 0, 1, 0], [], []>} : vector<8x8xbf16>, vector<8x8xbf16>, vector<8x8xf32> -> vector<8x8xf32>
    %36 = arith.addf %35, %12 : vector<8x8xf32>
    %cst_25 = arith.constant dense<0xFF800000> : vector<8xf32>
    %37 = vector.multi_reduction <maximumf>, %36, %cst_25 [1] : vector<8x8xf32> to vector<8xf32>
    %38 = vector.shape_cast %37 : vector<8xf32> to vector<8x1xf32>
    %39 = vector.broadcast %38 : vector<8x1xf32> to vector<8x8xf32>
    %40 = arith.subf %36, %39 : vector<8x8xf32>
    %41 = math.exp %40 : vector<8x8xf32>
    %cst_26 = arith.constant dense<0.000000e+00> : vector<8xf32>
    %42 = vector.multi_reduction <add>, %41, %cst_26 [1] : vector<8x8xf32> to vector<8xf32>
    %43 = vector.shape_cast %42 : vector<8xf32> to vector<8x1xf32>
    %44 = arith.truncf %41 : vector<8x8xf32> to vector<8x8xbf16>
    %cst_27 = arith.constant dense<0.000000e+00> : vector<8x8xf32>
    %45 = tpu.matmul %44, %34, %cst_27 {dimension_numbers = #tpu.dot_dimension_numbers<[1], [0], [0], [1], [0, 0, 1, 1], [], []>} : vector<8x8xbf16>, vector<8x8xbf16>, vector<8x8xf32> -> vector<8x8xf32>
    %46 = tpu.reciprocal %43 {approx = true} : vector<8x1xf32> -> vector<8x1xf32>
    %47 = vector.broadcast %46 : vector<8x1xf32> to vector<8x8xf32>
    %48 = arith.mulf %45, %47 : vector<8x8xf32>
    %49 = arith.truncf %48 : vector<8x8xf32> to vector<8x8xbf16>
    %c0_28 = arith.constant 0 : index
    %c8_29 = arith.constant 8 : index
    %50 = vector.load %arg12[%c0_28, %c8_29] : memref<8x32xbf16, #tpu.memory_space<vmem>>, vector<8x8xbf16>
    tpu.vector_store %arg12[%c0_28, %c8_29], %49 {strides = array<i32>} : memref<8x32xbf16, #tpu.memory_space<vmem>>, vector<8x8xbf16>,
    %c0_30 = arith.constant 0 : index
    %c16 = arith.constant 16 : index
    %51 = vector.load %arg11[%c0_30, %c16] : memref<8x96xbf16, #tpu.memory_space<vmem>>, vector<8x8xbf16>
    %c0_31 = arith.constant 0 : index
    %c48 = arith.constant 48 : index
    %52 = vector.load %arg11[%c0_31, %c48] : memref<8x96xbf16, #tpu.memory_space<vmem>>, vector<8x8xbf16>
    %c0_32 = arith.constant 0 : index
    %c80 = arith.constant 80 : index
    %53 = vector.load %arg11[%c0_32, %c80] : memref<8x96xbf16, #tpu.memory_space<vmem>>, vector<8x8xbf16>
    %cst_33 = arith.constant dense<0.000000e+00> : vector<8x8xf32>
    %54 = tpu.matmul %51, %52, %cst_33 {dimension_numbers = #tpu.dot_dimension_numbers<[1], [1], [0], [0], [0, 0, 1, 0], [], []>} : vector<8x8xbf16>, vector<8x8xbf16>, vector<8x8xf32> -> vector<8x8xf32>
    %55 = arith.addf %54, %12 : vector<8x8xf32>
    %cst_34 = arith.constant dense<0xFF800000> : vector<8xf32>
    %56 = vector.multi_reduction <maximumf>, %55, %cst_34 [1] : vector<8x8xf32> to vector<8xf32>
    %57 = vector.shape_cast %56 : vector<8xf32> to vector<8x1xf32>
    %58 = vector.broadcast %57 : vector<8x1xf32> to vector<8x8xf32>
    %59 = arith.subf %55, %58 : vector<8x8xf32>
    %60 = math.exp %59 : vector<8x8xf32>
    %cst_35 = arith.constant dense<0.000000e+00> : vector<8xf32>
    %61 = vector.multi_reduction <add>, %60, %cst_35 [1] : vector<8x8xf32> to vector<8xf32>
    %62 = vector.shape_cast %61 : vector<8xf32> to vector<8x1xf32>
    %63 = arith.truncf %60 : vector<8x8xf32> to vector<8x8xbf16>
    %cst_36 = arith.constant dense<0.000000e+00> : vector<8x8xf32>
    %64 = tpu.matmul %63, %53, %cst_36 {dimension_numbers = #tpu.dot_dimension_numbers<[1], [0], [0], [1], [0, 0, 1, 1], [], []>} : vector<8x8xbf16>, vector<8x8xbf16>, vector<8x8xf32> -> vector<8x8xf32>
    %65 = tpu.reciprocal %62 {approx = true} : vector<8x1xf32> -> vector<8x1xf32>
    %66 = vector.broadcast %65 : vector<8x1xf32> to vector<8x8xf32>
    %67 = arith.mulf %64, %66 : vector<8x8xf32>
    %68 = arith.truncf %67 : vector<8x8xf32> to vector<8x8xbf16>
    %c0_37 = arith.constant 0 : index
    %c16_38 = arith.constant 16 : index
    %69 = vector.load %arg12[%c0_37, %c16_38] : memref<8x32xbf16, #tpu.memory_space<vmem>>, vector<8x8xbf16>
    tpu.vector_store %arg12[%c0_37, %c16_38], %68 {strides = array<i32>} : memref<8x32xbf16, #tpu.memory_space<vmem>>, vector<8x8xbf16>,
    %c0_39 = arith.constant 0 : index
    %c24 = arith.constant 24 : index
    %70 = vector.load %arg11[%c0_39, %c24] : memref<8x96xbf16, #tpu.memory_space<vmem>>, vector<8x8xbf16>
    %c0_40 = arith.constant 0 : index
    %c56 = arith.constant 56 : index
    %71 = vector.load %arg11[%c0_40, %c56] : memref<8x96xbf16, #tpu.memory_space<vmem>>, vector<8x8xbf16>
    %c0_41 = arith.constant 0 : index
    %c88 = arith.constant 88 : index
    %72 = vector.load %arg11[%c0_41, %c88] : memref<8x96xbf16, #tpu.memory_space<vmem>>, vector<8x8xbf16>
    %cst_42 = arith.constant dense<0.000000e+00> : vector<8x8xf32>
    %73 = tpu.matmul %70, %71, %cst_42 {dimension_numbers = #tpu.dot_dimension_numbers<[1], [1], [0], [0], [0, 0, 1, 0], [], []>} : vector<8x8xbf16>, vector<8x8xbf16>, vector<8x8xf32> -> vector<8x8xf32>
    %74 = arith.addf %73, %12 : vector<8x8xf32>
    %cst_43 = arith.constant dense<0xFF800000> : vector<8xf32>
    %75 = vector.multi_reduction <maximumf>, %74, %cst_43 [1] : vector<8x8xf32> to vector<8xf32>
    %76 = vector.shape_cast %75 : vector<8xf32> to vector<8x1xf32>
    %77 = vector.broadcast %76 : vector<8x1xf32> to vector<8x8xf32>
    %78 = arith.subf %74, %77 : vector<8x8xf32>
    %79 = math.exp %78 : vector<8x8xf32>
    %cst_44 = arith.constant dense<0.000000e+00> : vector<8xf32>
    %80 = vector.multi_reduction <add>, %79, %cst_44 [1] : vector<8x8xf32> to vector<8xf32>
    %81 = vector.shape_cast %80 : vector<8xf32> to vector<8x1xf32>
    %82 = arith.truncf %79 : vector<8x8xf32> to vector<8x8xbf16>
    %cst_45 = arith.constant dense<0.000000e+00> : vector<8x8xf32>
    %83 = tpu.matmul %82, %72, %cst_45 {dimension_numbers = #tpu.dot_dimension_numbers<[1], [0], [0], [1], [0, 0, 1, 1], [], []>} : vector<8x8xbf16>, vector<8x8xbf16>, vector<8x8xf32> -> vector<8x8xf32>
    %84 = tpu.reciprocal %81 {approx = true} : vector<8x1xf32> -> vector<8x1xf32>
    %85 = vector.broadcast %84 : vector<8x1xf32> to vector<8x8xf32>
    %86 = arith.mulf %83, %85 : vector<8x8xf32>
    %87 = arith.truncf %86 : vector<8x8xf32> to vector<8x8xbf16>
    %c0_46 = arith.constant 0 : index
    %c24_47 = arith.constant 24 : index
    %88 = vector.load %arg12[%c0_46, %c24_47] : memref<8x32xbf16, #tpu.memory_space<vmem>>, vector<8x8xbf16>
    tpu.vector_store %arg12[%c0_46, %c24_47], %87 {strides = array<i32>} : memref<8x32xbf16, #tpu.memory_space<vmem>>, vector<8x8xbf16>,
    %c0_48 = arith.constant 0 : index
    %c0_49 = arith.constant 0 : index
    %89 = vector.load %arg9[%c0_48, %c0_49] : memref<6x32xf32, #tpu.memory_space<vmem>>, vector<1x32xf32>
    %c1 = arith.constant 1 : index
    %c0_50 = arith.constant 0 : index
    %90 = vector.load %arg9[%c1, %c0_50] : memref<6x32xf32, #tpu.memory_space<vmem>>, vector<1x32xf32>
    %c2 = arith.constant 2 : index
    %c0_51 = arith.constant 0 : index
    %91 = vector.load %arg9[%c2, %c0_51] : memref<6x32xf32, #tpu.memory_space<vmem>>, vector<1x32xf32>
    %c3 = arith.constant 3 : index
    %c0_52 = arith.constant 0 : index
    %92 = vector.load %arg9[%c3, %c0_52] : memref<6x32xf32, #tpu.memory_space<vmem>>, vector<1x32xf32>
    %c4 = arith.constant 4 : index
    %c0_53 = arith.constant 0 : index
    %93 = vector.load %arg9[%c4, %c0_53] : memref<6x32xf32, #tpu.memory_space<vmem>>, vector<1x32xf32>
    %c5 = arith.constant 5 : index
    %c0_54 = arith.constant 0 : index
    %94 = vector.load %arg9[%c5, %c0_54] : memref<6x32xf32, #tpu.memory_space<vmem>>, vector<1x32xf32>
    %c0_55 = arith.constant 0 : index
    %c0_56 = arith.constant 0 : index
    %95 = vector.load %arg12[%c0_55, %c0_56] : memref<8x32xbf16, #tpu.memory_space<vmem>>, vector<8x32xbf16>
    %c0_57 = arith.constant 0 : index
    %c0_58 = arith.constant 0 : index
    %96 = vector.load %arg5[%c0_57, %c0_58] : memref<32x32xbf16, #tpu.memory_space<vmem>>, vector<32x32xbf16>
    %cst_59 = arith.constant dense<0.000000e+00> : vector<8x32xf32>
    %97 = tpu.matmul %95, %96, %cst_59 {dimension_numbers = #tpu.dot_dimension_numbers<[1], [0], [0], [1], [0, 0, 1, 1], [], []>} : vector<8x32xbf16>, vector<32x32xbf16>, vector<8x32xf32> -> vector<8x32xf32>
    %98 = vector.broadcast %89 : vector<1x32xf32> to vector<8x32xf32>
    %99 = arith.addf %97, %98 : vector<8x32xf32>
    %cst_60 = arith.constant dense<0.000000e+00> : vector<8xf32>
    %100 = vector.multi_reduction <add>, %99, %cst_60 [1] : vector<8x32xf32> to vector<8xf32>
    %101 = vector.shape_cast %100 : vector<8xf32> to vector<8x1xf32>
    %cst_61 = arith.constant 3.200000e+01 : f32
    %102 = vector.broadcast %cst_61 : f32 to vector<8x1xf32>
    %103 = arith.divf %101, %102 : vector<8x1xf32>
    %104 = vector.broadcast %103 : vector<8x1xf32> to vector<8x32xf32>
    %105 = arith.subf %99, %104 : vector<8x32xf32>
    %106 = arith.mulf %105, %105 : vector<8x32xf32>
    %cst_62 = arith.constant dense<0.000000e+00> : vector<8xf32>
    %107 = vector.multi_reduction <add>, %106, %cst_62 [1] : vector<8x32xf32> to vector<8xf32>
    %108 = vector.shape_cast %107 : vector<8xf32> to vector<8x1xf32>
    %cst_63 = arith.constant 3.200000e+01 : f32
    %109 = vector.broadcast %cst_63 : f32 to vector<8x1xf32>
    %110 = arith.divf %108, %109 : vector<8x1xf32>
    %111 = vector.broadcast %103 : vector<8x1xf32> to vector<8x32xf32>
    %112 = arith.subf %99, %111 : vector<8x32xf32>
    %cst_64 = arith.constant 9.99999974E-6 : f32
    %113 = vector.broadcast %cst_64 : f32 to vector<8x1xf32>
    %114 = arith.addf %110, %113 : vector<8x1xf32>
    %115 = math.rsqrt %114 : vector<8x1xf32>
    %116 = vector.broadcast %115 : vector<8x1xf32> to vector<8x32xf32>
    %117 = arith.mulf %112, %116 : vector<8x32xf32>
    %118 = vector.broadcast %90 : vector<1x32xf32> to vector<8x32xf32>
    %119 = arith.mulf %117, %118 : vector<8x32xf32>
    %120 = vector.broadcast %91 : vector<1x32xf32> to vector<8x32xf32>
    %121 = arith.addf %119, %120 : vector<8x32xf32>
    %122 = arith.addf %121, %2 : vector<8x32xf32>
    %123 = arith.truncf %122 : vector<8x32xf32> to vector<8x32xbf16>
    %c0_65 = arith.constant 0 : index
    %c0_66 = arith.constant 0 : index
    %124 = vector.load %arg6[%c0_65, %c0_66] : memref<32x128xbf16, #tpu.memory_space<vmem>>, vector<32x128xbf16>
    %cst_67 = arith.constant dense<0.000000e+00> : vector<8x128xf32>
    %125 = tpu.matmul %123, %124, %cst_67 {dimension_numbers = #tpu.dot_dimension_numbers<[1], [0], [0], [1], [0, 0, 1, 1], [], []>} : vector<8x32xbf16>, vector<32x128xbf16>, vector<8x128xf32> -> vector<8x128xf32>
    %c0_68 = arith.constant 0 : index
    %c0_69 = arith.constant 0 : index
    %126 = vector.load %arg7[%c0_68, %c0_69] : memref<1x128xf32, #tpu.memory_space<vmem>>, vector<1x128xf32>
    %127 = vector.broadcast %126 : vector<1x128xf32> to vector<8x128xf32>
    %128 = arith.addf %125, %127 : vector<8x128xf32>
    %cst_70 = arith.constant 0.000000e+00 : f32
    %129 = vector.broadcast %cst_70 : f32 to vector<8x128xf32>
    %130 = arith.cmpf ogt, %128, %129 : vector<8x128xf32>
    %cst_71 = arith.constant 0.000000e+00 : f32
    %131 = vector.broadcast %cst_71 : f32 to vector<8x128xf32>
    %132 = arith.minimumf %128, %131 : vector<8x128xf32>
    %133 = math.exp %132 : vector<8x128xf32>
    %cst_72 = arith.constant 1.000000e+00 : f32
    %134 = vector.broadcast %cst_72 : f32 to vector<8x128xf32>
    %135 = arith.subf %133, %134 : vector<8x128xf32>
    %136 = arith.select %130, %128, %135 : vector<8x128xi1>, vector<8x128xf32>
    %137 = arith.truncf %136 : vector<8x128xf32> to vector<8x128xbf16>
    %c0_73 = arith.constant 0 : index
    %c0_74 = arith.constant 0 : index
    %138 = vector.load %arg8[%c0_73, %c0_74] : memref<128x32xbf16, #tpu.memory_space<vmem>>, vector<128x32xbf16>
    %cst_75 = arith.constant dense<0.000000e+00> : vector<8x32xf32>
    %139 = tpu.matmul %137, %138, %cst_75 {dimension_numbers = #tpu.dot_dimension_numbers<[1], [0], [0], [1], [0, 0, 1, 1], [], []>} : vector<8x128xbf16>, vector<128x32xbf16>, vector<8x32xf32> -> vector<8x32xf32>
    %140 = vector.broadcast %92 : vector<1x32xf32> to vector<8x32xf32>
    %141 = arith.addf %139, %140 : vector<8x32xf32>
    %cst_76 = arith.constant dense<0.000000e+00> : vector<8xf32>
    %142 = vector.multi_reduction <add>, %141, %cst_76 [1] : vector<8x32xf32> to vector<8xf32>
    %143 = vector.shape_cast %142 : vector<8xf32> to vector<8x1xf32>
    %cst_77 = arith.constant 3.200000e+01 : f32
    %144 = vector.broadcast %cst_77 : f32 to vector<8x1xf32>
    %145 = arith.divf %143, %144 : vector<8x1xf32>
    %146 = vector.broadcast %145 : vector<8x1xf32> to vector<8x32xf32>
    %147 = arith.subf %141, %146 : vector<8x32xf32>
    %148 = arith.mulf %147, %147 : vector<8x32xf32>
    %cst_78 = arith.constant dense<0.000000e+00> : vector<8xf32>
    %149 = vector.multi_reduction <add>, %148, %cst_78 [1] : vector<8x32xf32> to vector<8xf32>
    %150 = vector.shape_cast %149 : vector<8xf32> to vector<8x1xf32>
    %cst_79 = arith.constant 3.200000e+01 : f32
    %151 = vector.broadcast %cst_79 : f32 to vector<8x1xf32>
    %152 = arith.divf %150, %151 : vector<8x1xf32>
    %153 = vector.broadcast %145 : vector<8x1xf32> to vector<8x32xf32>
    %154 = arith.subf %141, %153 : vector<8x32xf32>
    %cst_80 = arith.constant 9.99999974E-6 : f32
    %155 = vector.broadcast %cst_80 : f32 to vector<8x1xf32>
    %156 = arith.addf %152, %155 : vector<8x1xf32>
    %157 = math.rsqrt %156 : vector<8x1xf32>
    %158 = vector.broadcast %157 : vector<8x1xf32> to vector<8x32xf32>
    %159 = arith.mulf %154, %158 : vector<8x32xf32>
    %160 = vector.broadcast %93 : vector<1x32xf32> to vector<8x32xf32>
    %161 = arith.mulf %159, %160 : vector<8x32xf32>
    %162 = vector.broadcast %94 : vector<1x32xf32> to vector<8x32xf32>
    %163 = arith.addf %161, %162 : vector<8x32xf32>
    %164 = arith.addf %163, %122 : vector<8x32xf32>
    %165 = vector.shape_cast %164 : vector<8x32xf32> to vector<1x8x32xf32>
    %c0_81 = arith.constant 0 : index
    %c0_82 = arith.constant 0 : index
    %c0_83 = arith.constant 0 : index
    %166 = vector.load %arg10[%c0_81, %c0_82, %c0_83] : memref<1x8x32xf32, #tpu.memory_space<vmem>>, vector<1x8x32xf32>
    tpu.vector_store %arg10[%c0_81, %c0_82, %c0_83], %165 {strides = array<i32>} : memref<1x8x32xf32, #tpu.memory_space<vmem>>, vector<1x8x32xf32>,
    return
  }
  func.func @transform_0(%arg0: i32) -> (i32, i32, i32) {
    %c0_i32 = arith.constant 0 : i32
    %c0_i32_0 = arith.constant 0 : i32
    %c0_i32_1 = arith.constant 0 : i32
    return %arg0, %c0_i32, %c0_i32_0 : i32, i32, i32
  }
  func.func @transform_1(%arg0: i32) -> (i32, i32, i32) {
    %c0_i32 = arith.constant 0 : i32
    %c0_i32_0 = arith.constant 0 : i32
    %c0_i32_1 = arith.constant 0 : i32
    return %arg0, %c0_i32, %c0_i32_0 : i32, i32, i32
  }
  func.func @transform_2(%arg0: i32) -> (i32, i32) {
    %c0_i32 = arith.constant 0 : i32
    %c0_i32_0 = arith.constant 0 : i32
    %c0_i32_1 = arith.constant 0 : i32
    return %c0_i32, %c0_i32_0 : i32, i32
  }
  func.func @transform_3(%arg0: i32) -> (i32, i32) {
    %c0_i32 = arith.constant 0 : i32
    %c0_i32_0 = arith.constant 0 : i32
    %c0_i32_1 = arith.constant 0 : i32
    return %c0_i32, %c0_i32_0 : i32, i32
  }
  func.func @transform_4(%arg0: i32) -> (i32, i32) {
    %c0_i32 = arith.constant 0 : i32
    %c0_i32_0 = arith.constant 0 : i32
    %c0_i32_1 = arith.constant 0 : i32
    return %c0_i32, %c0_i32_0 : i32, i32
  }
  func.func @transform_5(%arg0: i32) -> (i32, i32) {
    %c0_i32 = arith.constant 0 : i32
    %c0_i32_0 = arith.constant 0 : i32
    %c0_i32_1 = arith.constant 0 : i32
    return %c0_i32, %c0_i32_0 : i32, i32
  }
  func.func @transform_6(%arg0: i32) -> (i32, i32) {
    %c0_i32 = arith.constant 0 : i32
    %c0_i32_0 = arith.constant 0 : i32
    %c0_i32_1 = arith.constant 0 : i32
    return %c0_i32, %c0_i32_0 : i32, i32
  }
  func.func @transform_7(%arg0: i32) -> (i32, i32) {
    %c0_i32 = arith.constant 0 : i32
    %c0_i32_0 = arith.constant 0 : i32
    %c0_i32_1 = arith.constant 0 : i32
    return %c0_i32, %c0_i32_0 : i32, i32
  }
  func.func @transform_8(%arg0: i32) -> (i32, i32) {
    %c0_i32 = arith.constant 0 : i32
    %c0_i32_0 = arith.constant 0 : i32
    %c0_i32_1 = arith.constant 0 : i32
    return %c0_i32, %c0_i32_0 : i32, i32
  }
  func.func @transform_9(%arg0: i32) -> (i32, i32, i32) {
    %c0_i32 = arith.constant 0 : i32
    %c0_i32_0 = arith.constant 0 : i32
    %c0_i32_1 = arith.constant 0 : i32
    return %arg0, %c0_i32, %c0_i32_0 : i32, i32, i32
  }
}

</mosaic_0001>

<bundles_post_ra>
// kernel: tpu_custom_call.1
= control target key start
LH: loop header
LB: loop body
LE: loop exit
PB: predicated region body
PF: predicated region fallthrough
CT: control target
= control target key end

     0   :  { %14 = vsyncpa [#allocation5], 0  ;;  %s1967_s0 = inlined_call_operand.vmem [shape: bf16[2,8,32], index: 0, kind: input, shape index: {}]   ;;  %s1968_s1 = inlined_call_operand.vmem [shape: bf16[2,8,8], index: 1, kind: input, shape index: {}]   ;;  %s1969_s2 = inlined_call_operand.vmem [shape: bf16[32,96], index: 2, kind: input, shape index: {}]   ;;  %s1970_s3 = inlined_call_operand.vmem [shape: f32[1,96], index: 3, kind: input, shape index: {}]   ;;  %s1971_s4 = inlined_call_operand.vmem [shape: bf16[32,32], index: 4, kind: input, shape index: {}]   ;;  %s1972_s5 = inlined_call_operand.vmem [shape: bf16[32,128], index: 5, kind: input, shape index: {}]   ;;  %s1973_s6 = inlined_call_operand.vmem [shape: f32[1,128], index: 6, kind: input, shape index: {}]   ;;  %s1974_s7 = inlined_call_operand.vmem [shape: bf16[128,32], index: 7, kind: input, shape index: {}]   ;;  %s1975_s8 = inlined_call_operand.vmem [shape: f32[6,32], index: 8, kind: input, shape index: {}]   ;;  %s1976_s9 = inlined_call_operand.hbm [shape: f32[2,8,32], index: 9, kind: output, shape index: {}]  }
   0x1   :  { %16 = vsyncpa [#allocation5 + $0x1], 0  ;;  %s1698_s30 = smov 0   ;;  %s1700_s10 = smov 0  }
   0x2   :  { %s1702_s11 = smov 0   ;;  %s1704_s12 = smov 0  }
   0x3 LB: > { %s1719_s13 = sadd.s32 4294967295, %s1629_s12   ;;  %s1293_s14 = sadd.s32 4294967294, %s1629_s12   ;;  %s1629_s12 = sphi %s1704_s12, %s1982_s12   ;;  %s1625_s11 = sphi %s1702_s11, %s1981_s11   ;;  %s1621_s10 = sphi %s1700_s10, %s1980_s10   ;;  %s1617_s30 = sphi %s1698_s30, %s1979_s30  }
   0x4   : > { %s1723_s15 = sadd.s32 1, %s1629_s12   ;;  %s228_s16 = sadd.s32 1, %s1625_s11 }
   0x5   : > { %s225_s17 = ssub.s32 %s1629_s12, %s1723_s15  ;;  %p238_p0 = scmp.ne.s32.totalorder %s1625_s11, %s1621_s10 }
   0x6   : > { %p226_p1 = scmp.eq.s32.totalorder %s225_s17, 0  ;;  %p239_p2 = scmp.eq.s32.totalorder %s1719_s13, 1 }
   0x7   : > { %p244_p3 = scmp.ne.s32.totalorder %s1621_s10, %s1617_s30  ;;  %p245_p4 = scmp.eq.s32.totalorder %s1293_s14, 1 }
   0x8   : > { %s1734_s18 = scalar_select %p226_p1, %s1625_s11, %s228_s16  }
   0x9   : > { %p1736_p5 = por %p239_p2, %p238_p0  ;;  %p1740_p6 = por %p245_p4, %p244_p3 }
   0xa   : > { %p1296_p7 = scmp.ge.s32.totalorder %s1629_s12, 1  ;;  %p298_p8 = scmp.lt.s32.totalorder %s1629_s12, 3 }
   0xc   : > { %p299_p9 = pnand %p1296_p7, %p298_p8 }
   0xd   : > { %p337_p10 = scmp.lt.s32.totalorder (!%p299_p9), %s1719_s13, 1  ;;  %s1633_s17 = smov (!%p299_p9), 120  }
   0xe   : > { %302 = sbr.rel (%p299_p9) target bundleno = 2329 (0x919), region = 56  ;;  %s1634_s21 = smov (!%p299_p9), 96  }
   0xf   : > { %s1635_s22 = smov (!%p299_p9), 80   ;;  %s1636_s23 = smov (!%p299_p9), 88  }
  0x10   : > { %s1637_s24 = smov (!%p299_p9), 72   ;;  %s1638_s27 = smov (!%p299_p9), 112  }
  0x11   : > { %s1639_s28 = smov (!%p299_p9), 104   ;;  %s1646_s14 = smov (!%p299_p9), 24  }
  0x13   : > { %v1529_v0 = vld [vmem:[%s1969_s2 + $0x8] sm:$0xff]   ;;  %v1631_v1 = vmov 0.0   ;;  %v1530_v2 = vld [vmem:[%s1969_s2] sm:$0xff]   ;;  %vm1632_vm0 = vmmov 0   ;;  %s1761_s25 = scalar_select %p337_p10, %s1719_s13, 1  ;;  %vm371_vm1 = vcmask 261120  }
  0x14   : > { %1382 = vmatprep.subr.bf16.mxu0 %v1631_v1  ;;  %1402 = vmatprep.subr.bf16.mxu1 %v1631_v1  ;;  %v1300_v4 = vld [vmem:[%s1970_s3] ss:$0 sm:$0xff]  ;;  %vm416_vm2 = vcmask 781312   ;;  %vm426_vm3 = vcmask 64512   ;;  %vm488_vm4 = vcmask 1043456   ;;  %vm535_vm5 = vcmask 60416  }
  0x15   : > { %1383 = vmatpush3.bf16.msra.mxu0 %v1529_v0  ;;  %1386 = vmatprep.mubr.msk.bf16.mxu0 %vm1632_vm0, %v1631_v1  ;;  %s1298_s26 = sshll.u32 %s1761_s25, 2  ;;  %s1640_s25 = smov 56   ;;  %vm658_vm6 = vcmask 126016   ;;  %vm781_vm7 = vcmask 191616   ;;  %vm904_vm8 = vcmask 257216  }
  0x16   : > { %1384 = vmatprep.subr.bf16.mxu0 %v1631_v1  ;;  %1404 = vmatprep.mubr.msk.bf16.mxu1 %vm1632_vm0, %v1631_v1  ;;  %s340_s29 = scalar_lea.vmem %s1967_s0, %s1298_s26  ;;  %s344_s16 = scalar_lea.vmem %s1968_s1, %s1298_s26 }
  0x17   : > { %v1770_v3 = vld [vmem:[%s340_s29] sm:$0xf]  ;;  %s1641_s26 = smov 64   ;;  %s1647_s29 = smov [#allocation4]  }
  0x18   : > { %v418_v27 = vld [vmem:[%s344_s16] sm:$0xf]  ;;  %s1342_s16 = sshll.u32 %s1719_s13, 7  ;;  %s1573_s13 = sshll.u32 %s1647_s29, 4  ;;  %s1574_s13 = int_to_ptr.vmem [resolvable:$false] %s1573_s13 }
  0x19   : > { %1385 = vmatpush3.bf16.msra.mxu0 %v1530_v2  ;;  %v419_v28 = vunpack.c.l.bf16 %v418_v27 }
  0x1a   : > { %1390 = vmatprep.subr.bf16.mxu0 %v1631_v1 }
  0x1c   : > { %1387 = vmatmul.mubr.msk.bf16.vlgmr.msra.gmra.mxu0 %vm371_vm1, %v1770_v3 }
  0x1d   : > { %1392 = vmatprep.mubr.msk.bf16.mxu0 %vm1632_vm0, %v1631_v1 }
  0xdc   : > { %v409_v5 = vpop.f32.mrf.mxu0 }
  0xdd   : > { %v410_v6 = vadd.f32 %v1300_v4, %v409_v5 }
  0xde   : > { %v1388_v7 = vpop.f32.mrf.mxu0 }
  0xdf   : > { %v415_v8 = vpack.c.bf16 %v410_v6, %v410_v6 }
  0xe0   : > { %v412_v9 = vpop.f32.mrf.mxu0 }
  0xe1   : > { %417 = vst.msk [vmem:[#allocation2] sm:$0xf] %vm416_vm2, %v415_v8 }
  0xe2   : > { %v1389_v10 = vpop.f32.mrf.mxu0 }
  0xe8   : > { %v1779_v11 = vld [vmem:[#allocation2] ss:$0 sps:$4 sm:$0xff]  }
  0xe9   : > { %v420_v12 = vld [vmem:[#allocation2] sm:$0xf]  ;;  %541 = vrot.lane.b32.xlu1 %v1779_v11, %s1633_s17  ;;  %s1642_s17 = smov 40  }
  0xea   : > { %v1781_v13 = vcombine.low %v420_v12, %v420_v12  ;;  %v1785_v14 = vld [vmem:[#allocation2] ss:$0 sps:$4 sm:$0xff]  }
  0xeb   : > { %v1789_v15 = vld [vmem:[#allocation2] ss:$0 sps:$4 sm:$0xff]  }
  0xec   : > { %424 = vrot.lane.b32.xlu0 %v1781_v13, %s1634_s21  ;;  %s1643_s21 = smov 48  }
  0xed   : > { %666 = vrot.lane.b32.xlu1 %v1785_v14, %s1635_s22  ;;  %s1644_s22 = smov 8  }
  0xf0   : > { %543 = vrot.lane.b32.xlu0 %v1779_v11, %s1636_s23  ;;  %s334_s23 = sand.u32 1, %s1621_s10  }
  0xf1   : > { %789 = vrot.lane.b32.xlu1 %v1789_v15, %s1637_s24  ;;  %s1297_s24 = sshll.u32 %s334_s23, 3 }
  0xf4   : > { %664 = vrot.lane.b32.xlu0 %v1785_v14, %s1638_s27  ;;  %s1645_s27 = smov 16  }
  0xf8   : > { %787 = vrot.lane.b32.xlu0 %v1789_v15, %s1639_s28 }
 0x15b   : > { %v542_v18 = vpop.permute.xlu1 %541 }
 0x15e   : > { %v425_v16 = vpop.permute.xlu0 %424 }
 0x15f   : > { %v431_v17 = vsel %vm426_vm3, %v425_v16, 0  ;;  %v667_v21 = vpop.permute.xlu1 %666 }
 0x160   : > { %1391 = vmatpush3.bf16.xpose.msra.mxu0 %v431_v17  ;;  %v672_v22 = vsel %vm426_vm3, %v667_v21, 0 }
 0x161   : > { %1396 = vmatprep.subr.bf16.mxu0 %v1631_v1 }
 0x162   : > { %v544_v19 = vpop.permute.xlu0 %543 }
 0x163   : > { %v549_v20 = vsel %vm426_vm3, %v544_v19, 0  ;;  %v790_v23 = vpop.permute.xlu1 %789 }
 0x164   : > { %1403 = vmatpush3.bf16.xpose.msra.mxu1 %v549_v20  ;;  %v795_v25 = vsel %vm426_vm3, %v790_v23, 0 }
 0x165   : > { %1414 = vmatprep.subr.bf16.mxu1 %v1631_v1 }
 0x166   : > { %v665_v24 = vpop.permute.xlu0 %664 }
 0x167   : > { %1393 = vmatmul.mubr.msk.bf16.vlgmr.msra.gmra.mxu0 %vm426_vm3, %v420_v12 }
 0x168   : > { %1398 = vmatprep.mubr.msk.bf16.mxu0 %vm1632_vm0, %v1631_v1 }
 0x16a   : > { %v788_v26 = vpop.permute.xlu0 %787 }
 0x16b   : > { %1405 = vmatmul.mubr.msk.bf16.vlgmr.msra.gmra.mxu1 %vm426_vm3, %v542_v18 }
 0x16c   : > { %1415 = vmatpush3.bf16.xpose.msra.mxu1 %v672_v22  ;;  %1416 = vmatprep.mubr.msk.bf16.mxu1 %vm1632_vm0, %v1631_v1 }
 0x16d   : > { %1426 = vmatprep.subr.bf16.mxu1 %v1631_v1 }
 0x173   : > { %1417 = vmatmul.mubr.msk.bf16.vlgmr.msra.gmra.mxu1 %vm426_vm3, %v665_v24 }
 0x174   : > { %1427 = vmatpush3.bf16.xpose.msra.mxu1 %v795_v25  ;;  %1428 = vmatprep.mubr.msk.bf16.mxu1 %vm1632_vm0, %v1631_v1 }
 0x175   : > { %1438 = vmatprep.subr.bf16.mxu1 %v1631_v1 }
 0x17b   : > { %1429 = vmatmul.mubr.msk.bf16.vlgmr.msra.gmra.mxu1 %vm426_vm3, %v788_v26 }
 0x17c   : > { %1442 = vmatprep.mubr.msk.bf16.mxu1 %vm1632_vm0, %v1631_v1 }
 0x227   : > { %v467_v29 = vpop.f32.mrf.mxu0 }
 0x228   : > { %v468_v30 = vadd.f32 %v467_v29, %v419_v28 }
 0x229   : > { %v1394_v31 = vpop.f32.mrf.mxu0 }
 0x22a   : > { %v473_v32 = vsel %vm426_vm3, %v468_v30, -inf }
 0x22b   : > { %v585_v33 = vpop.f32.mrf.mxu1  ;;  %474 = vmax.xlane.f32.xlu1 %v473_v32  ;;  %v470_v34 = vpop.f32.mrf.mxu0 }
 0x22c   : > { %v586_v35 = vadd.f32 %v585_v33, %v419_v28 }
 0x22d   : > { %v1395_v36 = vpop.f32.mrf.mxu0  ;;  %v1406_v37 = vpop.f32.mrf.mxu1 }
 0x22e   : > { %v591_v38 = vsel %vm426_vm3, %v586_v35, -inf }
 0x22f   : > { %592 = vmax.xlane.f32.xlu0 %v591_v38  ;;  %v588_v39 = vpop.f32.mrf.mxu1 }
 0x231   : > { %v1407_v40 = vpop.f32.mrf.mxu1 }
 0x233   : > { %v708_v41 = vpop.f32.mrf.mxu1 }
 0x234   : > { %v709_v42 = vadd.f32 %v708_v41, %v419_v28 }
 0x235   : > { %v1418_v43 = vpop.f32.mrf.mxu1 }
 0x236   : > { %v714_v44 = vsel %vm426_vm3, %v709_v42, -inf }
 0x237   : > { %715 = vmax.xlane.f32.xlu0 %v714_v44  ;;  %v711_v45 = vpop.f32.mrf.mxu1 }
 0x239   : > { %v1419_v46 = vpop.f32.mrf.mxu1 }
 0x23b   : > { %v831_v47 = vpop.f32.mrf.mxu1 }
 0x23c   : > { %601 = vrot.lane.b32.xlu1 %v1779_v11, %s1640_s25  ;;  %v832_v51 = vadd.f32 %v831_v47, %v419_v28  ;;  %v1535_v47 = vld [vmem:[%s1971_s4 + $0x8] sm:$0xff]   ;;  %s336_s25 = scalar_lea.vmem [#allocation4], %s1297_s24  ;;  %s1575_s24 = scalar_lea.vmem %s1574_s13, 256 }
 0x23d   : > { %v1430_v48 = vpop.f32.mrf.mxu1  ;;  %1439 = vmatpush3.bf16.msra.mxu1 %v1535_v47 }
 0x23e   : > { %v837_v52 = vsel %vm426_vm3, %v832_v51, -inf  ;;  %1440 = vmatprep.subr.bf16.mxu1 %v1631_v1 }
 0x23f   : > { %v834_v49 = vpop.f32.mrf.mxu1 }
 0x240   : > { %v1536_v49 = vld [vmem:[%s1971_s4] sm:$0xff]  }
 0x241   : > { %v1431_v50 = vpop.f32.mrf.mxu1  ;;  %1441 = vmatpush3.bf16.msra.mxu1 %v1536_v49 }
 0x242   : > { %1454 = vmatprep.subr.bf16.mxu1 %v1631_v1 }
 0x24d   : > { %483 = vrot.lane.b32.xlu0 %v1781_v13, %s1641_s26  ;;  %s1222_s26 = sshll.u32 %s336_s25, 4  ;;  %s1223_s26 = int_to_ptr.vmem [resolvable:$true] %s1222_s26 }
 0x24e   : > { %s1569_s28 = scalar_lea.vmem %s1223_s26, 128  ;;  %p1576_p0 = scmp.lt.s32.totalorder %s1223_s26, %s1574_s13 }
 0x24f   : > { %p1570_p11 = scmp.ne.s32.totalorder %s1223_s26, %s1569_s28  ;;  %p1577_p1 = scmp.lt.s32.totalorder %s1575_s24, %s1569_s28 }
 0x251   : > { %847 = vrot.lane.b32.xlu0 %v1789_v15, %s1642_s17  ;;  %p1571_p12 = pnand %p1570_p11, %p1736_p5  ;;  %p1578_p2 = por %p1577_p1, %p1576_p0 }
 0x253   : > { %p1572_p13 = pneg %p1571_p12 }
 0x255   : > { %p1579_p3 = pnand %p1578_p2, %p1572_p13 }
 0x260   : > { %838 = vmax.xlane.f32.xlu1 %v837_v52 }
 0x271   : > { %724 = vrot.lane.b32.xlu1 %v1785_v14, %s1643_s21 }
 0x2b4   : > { %v475_v53 = vpop.xlane.xlu1 %474 }
 0x2b5   : > { %v476_v54 = vsub.f32 %v468_v30, %v475_v53 }
 0x2b7   : > { %v477_v55 = vmul.f32 1.442695, %v476_v54 }
 0x2b8   : > { %v593_v56 = vpop.xlane.xlu0 %592  ;;  %v602_v2 = vpop.permute.xlu1 %601 }
 0x2b9   : > { %1547 = vpow2.f32 %v477_v55  ;;  %v594_v57 = vsub.f32 %v586_v35, %v593_v56  ;;  %v607_v5 = vsel %vm488_vm4, %v602_v2, 0 }
 0x2bb   : > { %v595_v58 = vmul.f32 1.442695, %v594_v57 }
 0x2bd   : > { %1549 = vpow2.f32 %v595_v58 }
 0x2c0   : > { %v716_v59 = vpop.xlane.xlu0 %715 }
 0x2c1   : > { %v717_v60 = vsub.f32 %v709_v42, %v716_v59 }
 0x2c3   : > { %v718_v61 = vmul.f32 1.442695, %v717_v60 }
 0x2c4   : > { %v484_v62 = vpop.permute.xlu0 %483 }
 0x2c5   : > { %1551 = vpow2.f32 %v718_v61  ;;  %v490_v63 = vsel %vm488_vm4, %v484_v62, 0  ;;  %v1319_v61 = vld [vmem:[%s1975_s8] ss:$0 sm:$0xff] }
 0x2c6   : > { %v1548_v0 = vpop.eup %1547  ;;  %1397 = vmatpush3.bf16.msra.mxu0 %v490_v63 }
 0x2c7   : > { %v482_v4 = vpack.c.bf16 %v1548_v0, %v1548_v0  ;;  %1408 = vmatprep.subr.bf16.mxu0 %v1631_v1  ;;  %v479_v8 = vsel %vm426_vm3, %v1548_v0, 0.0 }
 0x2c8   : > { %v848_v17 = vpop.permute.xlu0 %847 }
 0x2c9   : > { %1399 = vmatmul.mubr.msk.bf16.vlgmr.msra.gmra.mxu0 %vm426_vm3, %v482_v4  ;;  %v853_v19 = vsel %vm488_vm4, %v848_v17, 0 }
 0x2ca   : > { %v1550_v6 = vpop.eup %1549  ;;  %1409 = vmatpush3.bf16.msra.mxu0 %v607_v5  ;;  %1410 = vmatprep.mubr.msk.bf16.mxu0 %vm1632_vm0, %v1631_v1 }
 0x2cb   : > { %v597_v7 = vsel %vm426_vm3, %v1550_v6, 0.0  ;;  %1420 = vmatprep.subr.bf16.mxu0 %v1631_v1  ;;  %v600_v9 = vpack.c.bf16 %v1550_v6, %v1550_v6 }
 0x2cc   : > { %598 = vadd.xlane.f32.xlu1 %v597_v7 }
 0x2d0   : > { %480 = vadd.xlane.f32.xlu1 %v479_v8 }
 0x2d1   : > { %1411 = vmatmul.mubr.msk.bf16.vlgmr.msra.gmra.mxu0 %vm426_vm3, %v600_v9 }
 0x2d2   : > { %v1552_v10 = vpop.eup %1551  ;;  %1422 = vmatprep.mubr.msk.bf16.mxu0 %vm1632_vm0, %v1631_v1 }
 0x2d3   : > { %v720_v11 = vsel %vm426_vm3, %v1552_v10, 0.0  ;;  %v723_v18 = vpack.c.bf16 %v1552_v10, %v1552_v10 }
 0x2d4   : > { %721 = vadd.xlane.f32.xlu0 %v720_v11  ;;  %v1537_v11 = vld [vmem:[%s1972_s5 + $0x8] sm:$0xff]  }
 0x2e9   : > { %v839_v12 = vpop.xlane.xlu1 %838 }
 0x2ea   : > { %v840_v13 = vsub.f32 %v832_v51, %v839_v12  ;;  %v1538_v12 = vld [vmem:[%s1972_s5] sm:$0xff]  }
 0x2ec   : > { %v841_v14 = vmul.f32 1.442695, %v840_v13  ;;  %v1539_v13 = vld [vmem:[%s1974_s7 + $0x38] sm:$0xff]  }
 0x2ed   : > { %v725_v15 = vpop.permute.xlu1 %724 }
 0x2ee   : > { %1553 = vpow2.f32 %v841_v14  ;;  %v730_v16 = vsel %vm488_vm4, %v725_v15, 0  ;;  %v1540_v14 = vld [vmem:[%s1974_s7 + $0x30] sm:$0xff]  }
 0x2ef   : > { %1421 = vmatpush3.bf16.msra.mxu0 %v730_v16 }
 0x2f0   : > { %1432 = vmatprep.subr.bf16.mxu0 %v1631_v1 }
 0x2f2   : > { %1423 = vmatmul.mubr.msk.bf16.vlgmr.msra.gmra.mxu0 %vm426_vm3, %v723_v18 }
 0x2f3   : > { %1433 = vmatpush3.bf16.msra.mxu0 %v853_v19  ;;  %1434 = vmatprep.mubr.msk.bf16.mxu0 %vm1632_vm0, %v1631_v1  ;;  %v1323_v19 = vld [vmem:[%s1975_s8 + $0x1] ss:$0 sm:$0xff] }
 0x2f4   : > { %1446 = vmatprep.subr.bf16.mxu0 %v1631_v1 }
 0x2fb   : > { %v1554_v20 = vpop.eup %1553 }
 0x2fc   : > { %v843_v21 = vsel %vm426_vm3, %v1554_v20, 0.0  ;;  %v846_v22 = vpack.c.bf16 %v1554_v20, %v1554_v20 }
 0x2fd   : > { %844 = vadd.xlane.f32.xlu0 %v843_v21  ;;  %v1324_v21 = vld [vmem:[%s1975_s8 + $0x2] ss:$0 sm:$0xff] }
 0x2fe   : > { %1435 = vmatmul.mubr.msk.bf16.vlgmr.msra.gmra.mxu0 %vm426_vm3, %v846_v22  ;;  %v347_v22 = vunpack.c.l.bf16 %v1770_v3  ;;  %v1542_v3 = vld [vmem:[%s1974_s7 + $0x20] sm:$0xff]  }
 0x2ff   : > { %1450 = vmatprep.mubr.msk.bf16.mxu0 %vm1632_vm0, %v1631_v1  ;;  %1447 = vmatpush3.bf16.msra.mxu0 %v1537_v11 }
 0x300   : > { %1448 = vmatprep.subr.bf16.mxu0 %v1631_v1 }
 0x303   : > { %1449 = vmatpush3.bf16.msra.mxu0 %v1538_v12 }
 0x355   : > { %v599_v23 = vpop.xlane.xlu1 %598 }
 0x359   : > { %v481_v24 = vpop.xlane.xlu1 %480 }
 0x35a   : > { %1555 = vrcp.f32 %v481_v24 }
 0x35b   : > { %1557 = vrcp.f32 %v599_v23 }
 0x35d   : > { %v722_v39 = vpop.xlane.xlu0 %721 }
 0x35e   : > { %1559 = vrcp.f32 %v722_v39 }
 0x367   : > { %v1556_v25 = vpop.eup %1555 }
 0x368   : > { %v1558_v32 = vpop.eup %1557 }
 0x36b   : > { %v1560_v41 = vpop.eup %1559 }
 0x386   : > { %v845_v40 = vpop.xlane.xlu0 %844 }
 0x387   : > { %1561 = vrcp.f32 %v845_v40 }
 0x389   : > { %v526_v26 = vpop.f32.mrf.mxu0 }
 0x38a   : > { %v533_v27 = vmul.f32 %v1556_v25, %v526_v26 }
 0x38b   : > { %v1400_v28 = vpop.f32.mrf.mxu0 }
 0x38c   : > { %v534_v29 = vpack.c.bf16 %v533_v27, %v533_v27  ;;  %v1541_v27 = vld [vmem:[%s1974_s7 + $0x28] sm:$0xff]   ;;  %v1543_v28 = vld [vmem:[%s1974_s7 + $0x18] sm:$0xff]  }
 0x38d   : > { %v529_v30 = vpop.f32.mrf.mxu0 }
 0x38e   : > { %536 = vst.msk [vmem:[#allocation3] sm:$0xf] %vm535_vm5, %v534_v29  ;;  %v1544_v29 = vld [vmem:[%s1974_s7 + $0x10] sm:$0xff]   ;;  %v1545_v30 = vld [vmem:[%s1974_s7 + $0x8] sm:$0xff]  }
 0x38f   : > { %v1401_v31 = vpop.f32.mrf.mxu0 }
 0x390   : > { %v1546_v31 = vld [vmem:[%s1974_s7] sm:$0xff]  }
 0x391   : > { %v643_v33 = vpop.f32.mrf.mxu0 }
 0x392   : > { %v650_v34 = vmul.f32 %v1558_v32, %v643_v33  ;;  %v1325_v32 = vld [vmem:[%s1973_s6] ss:$0 sm:$0xff] }
 0x393   : > { %v1412_v35 = vpop.f32.mrf.mxu0 }
 0x394   : > { %v1345_v36 = vpack.c.bf16 %v650_v34, %v650_v34  ;;  %v1562_v50 = vpop.eup %1561 }
 0x395   : > { %v646_v37 = vpop.f32.mrf.mxu0 }
 0x396   : > { %655 = vrot.lane.b32.xlu0 %v1345_v36, %s1644_s22  ;;  %s1220_s22 = scalar_lea.hbm %s1976_s9, %s1342_s16 }
 0x397   : > { %v1413_v38 = vpop.f32.mrf.mxu0 }
 0x3b2   : > { %v766_v42 = vpop.f32.mrf.mxu0 }
 0x3b3   : > { %v773_v43 = vmul.f32 %v1560_v41, %v766_v42 }
 0x3b4   : > { %v1424_v44 = vpop.f32.mrf.mxu0 }
 0x3b5   : > { %v1346_v45 = vpack.c.bf16 %v773_v43, %v773_v43  ;;  %v1330_v43 = vld [vmem:[%s1975_s8 + $0x3] ss:$0 sm:$0xff] }
 0x3b6   : > { %v769_v46 = vpop.f32.mrf.mxu0 }
 0x3b7   : > { %778 = vrot.lane.b32.xlu1 %v1346_v45, %s1645_s27  ;;  %s1209_s27 = scalar_lea.sflag [#allocation5], %s334_s23 }
 0x3b8   : > { %v1425_v48 = vpop.f32.mrf.mxu0 }
 0x3be   : > { %v889_v51 = vpop.f32.mrf.mxu0 }
 0x3bf   : > { %v896_v52 = vmul.f32 %v1562_v50, %v889_v51 }
 0x3c0   : > { %v1436_v53 = vpop.f32.mrf.mxu0 }
 0x3c1   : > { %v1347_v54 = vpack.c.bf16 %v896_v52, %v896_v52 }
 0x3c2   : > { %v892_v55 = vpop.f32.mrf.mxu0 }
 0x3c3   : > { %901 = vrot.lane.b32.xlu1 %v1347_v54, %s1646_s14 }
 0x3c4   : > { %v1437_v56 = vpop.f32.mrf.mxu0 }
 0x408   : > { %v656_v57 = vpop.permute.xlu0 %655 }
 0x409   : > { %659 = vst.msk [vmem:[#allocation3] sm:$0xf] %vm658_vm6, %v656_v57 }
 0x429   : > { %v779_v58 = vpop.permute.xlu1 %778 }
 0x42a   : > { %782 = vst.msk [vmem:[#allocation3] sm:$0xf] %vm781_vm7, %v779_v58 }
 0x435   : > { %v902_v59 = vpop.permute.xlu1 %901 }
 0x436   : > { %905 = vst.msk [vmem:[#allocation3] sm:$0xf] %vm904_vm8, %v902_v59  ;;  %v1339_v59 = vld [vmem:[%s1975_s8 + $0x4] ss:$0 sm:$0xff] }
 0x43d   : > { %v912_v60 = vld [vmem:[#allocation3] sm:$0xf] }
 0x43e   : > { %1443 = vmatmul.mubr.msk.bf16.vlgmr.msra.gmra.mxu1 %vm371_vm1, %v912_v60 }
 0x43f   : > { %1470 = vmatprep.mubr.msk.bf16.mxu1 %vm1632_vm0, %v1631_v1  ;;  %1455 = vmatpush3.bf16.msra.mxu1 %v1539_v13 }
 0x440   : > { %1456 = vmatprep.subr.bf16.mxu1 %v1631_v1 }
 0x443   : > { %1457 = vmatpush3.bf16.msra.mxu1 %v1540_v14 }
 0x444   : > { %1458 = vmatprep.subr.bf16.mxu1 %v1631_v1 }
 0x447   : > { %1459 = vmatpush3.bf16.msra.mxu1 %v1541_v27 }
 0x448   : > { %1460 = vmatprep.subr.bf16.mxu1 %v1631_v1 }
 0x44b   : > { %1461 = vmatpush3.bf16.msra.mxu1 %v1542_v3 }
 0x44c   : > { %1462 = vmatprep.subr.bf16.mxu1 %v1631_v1 }
 0x44f   : > { %1463 = vmatpush3.bf16.msra.mxu1 %v1543_v28 }
 0x450   : > { %1464 = vmatprep.subr.bf16.mxu1 %v1631_v1 }
 0x453   : > { %1465 = vmatpush3.bf16.msra.mxu1 %v1544_v29 }
 0x454   : > { %1466 = vmatprep.subr.bf16.mxu1 %v1631_v1 }
 0x457   : > { %1467 = vmatpush3.bf16.msra.mxu1 %v1545_v30 }
 0x458   : > { %1468 = vmatprep.subr.bf16.mxu1 %v1631_v1 }
 0x45b   : > { %1469 = vmatpush3.bf16.msra.mxu1 %v1546_v31 }
 0x4fe   : > { %v970_v62 = vpop.f32.mrf.mxu1 }
 0x4ff   : > { %v971_v63 = vadd.f32 %v1319_v61, %v970_v62  ;;  %v1340_v61 = vld [vmem:[%s1975_s8 + $0x5] ss:$0 sm:$0xff] }
 0x500   : > { %v1444_v0 = vpop.f32.mrf.mxu1 }
 0x501   : > { %v976_v2 = vsel %vm371_vm1, %v971_v63, 0.0 }
 0x502   : > { %977 = vadd.xlane.f32.xlu0 %v976_v2  ;;  %v973_v4 = vpop.f32.mrf.mxu1 }
 0x504   : > { %v1445_v5 = vpop.f32.mrf.mxu1 }
 0x58b   : > { %v978_v6 = vpop.xlane.xlu0 %977 }
 0x58c   : > { %v980_v7 = vmul.f32 0.03125, %v978_v6 }
 0x58e   : > { %v981_v8 = vsub.f32 %v971_v63, %v980_v7 }
 0x590   : > { %v982_v9 = vmul.f32 %v981_v8, %v981_v8 }
 0x592   : > { %v983_v10 = vsel %vm371_vm1, %v982_v9, 0.0 }
 0x593   : > { %984 = vadd.xlane.f32.xlu1 %v983_v10 }
 0x61c   : > { %v985_v15 = vpop.xlane.xlu1 %984 }
 0x61d   : > { %v986_v16 = vmul.f32 0.03125, %v985_v15 }
 0x61f   : > { %v987_v17 = vadd.f32 1e-05, %v986_v16 }
 0x621   : > { %1563 = vrsqrt.f32 %v987_v17 }
 0x62e   : > { %v1564_v18 = vpop.eup %1563 }
 0x62f   : > { %v989_v20 = vmul.f32 %v1564_v18, %v981_v8 }
 0x631   : > { %v994_v23 = vmul.f32 %v1323_v19, %v989_v20 }
 0x633   : > { %v999_v24 = vadd.f32 %v1324_v21, %v994_v23 }
 0x635   : > { %v1889_v25 = vadd.f32 %v999_v24, %v347_v22 }
 0x637   : > { %v1001_v26 = vpack.c.bf16 %v1889_v25, %v1889_v25 }
 0x639   : > { %1451 = vmatmul.mubr.msk.bf16.vlgmr.msra.gmra.mxu0 %vm371_vm1, %v1001_v26 }
 0x6f9   : > { %v1062_v33 = vpop.f32.mrf.mxu0 }
 0x6fa   : > { %v1063_v34 = vadd.f32 %v1325_v32, %v1062_v33 }
 0x6fb   : > { %v1452_v35 = vpop.f32.mrf.mxu0 }
 0x6fc   : > { %v1069_v36 = vmin.f32 %v1063_v34, 0.0  ;;  %vm1068_vm9 = vcmp.gt.f32.partialorder %v1063_v34, 0.0 }
 0x6fd   : > { %v1065_v37 = vpop.f32.mrf.mxu0 }
 0x6fe   : > { %v1070_v38 = vmul.f32 1.442695, %v1069_v36 }
 0x6ff   : > { %v1453_v39 = vpop.f32.mrf.mxu0 }
 0x700   : > { %1565 = vpow2.f32 %v1070_v38 }
 0x70d   : > { %v1566_v40 = vpop.eup %1565 }
 0x70e   : > { %v1329_v41 = vadd.f32 -1.0, %v1566_v40 }
 0x710   : > { %v1073_v1 = vsel %vm1068_vm9, %v1063_v34, %v1329_v41 }
 0x711   : > { %v1074_v42 = vpack.c.bf16 %v1073_v1, %v1073_v1 }
 0x713   : > { %1471 = vmatmul.mubr.bf16.vlgmr.msra.gmra.mxu1 %v1074_v42 }
 0x7d3   : > { %v1177_v44 = vpop.f32.mrf.mxu1 }
 0x7d4   : > { %v1178_v45 = vadd.f32 %v1330_v43, %v1177_v44 }
 0x7d5   : > { %v1472_v46 = vpop.f32.mrf.mxu1 }
 0x7d6   : > { %v1183_v47 = vsel %vm371_vm1, %v1178_v45, 0.0 }
 0x7d7   : > { %1184 = vadd.xlane.f32.xlu0 %v1183_v47  ;;  %v1180_v48 = vpop.f32.mrf.mxu1 }
 0x7d9   : > { %v1473_v49 = vpop.f32.mrf.mxu1 }
 0x860   : > { %v1185_v50 = vpop.xlane.xlu0 %1184 }
 0x861   : > { %v1186_v51 = vmul.f32 0.03125, %v1185_v50 }
 0x863   : > { %v1187_v52 = vsub.f32 %v1178_v45, %v1186_v51 }
 0x865   : > { %v1188_v53 = vmul.f32 %v1187_v52, %v1187_v52 }
 0x867   : > { %v1189_v54 = vsel %vm371_vm1, %v1188_v53, 0.0 }
 0x868   : > { %1190 = vadd.xlane.f32.xlu0 %v1189_v54 }
 0x8f1   : > { %v1191_v55 = vpop.xlane.xlu0 %1190 }
 0x8f2   : > { %v1192_v56 = vmul.f32 0.03125, %v1191_v55 }
 0x8f4   : > { %v1193_v57 = vadd.f32 1e-05, %v1192_v56 }
 0x8f6   : > { %1567 = vrsqrt.f32 %v1193_v57 }
 0x903   : > { %v1568_v58 = vpop.eup %1567 }
 0x904   : > { %v1195_v60 = vmul.f32 %v1568_v58, %v1187_v52 }
 0x906   : > { %v1200_v62 = vmul.f32 %v1339_v59, %v1195_v60 }
 0x908   : > { %v1205_v63 = vadd.f32 %v1340_v61, %v1200_v62 }
 0x90a   : > { %v1206_v0 = vadd.f32 %v1205_v63, %v1889_v25 }
 0x90c   : > { %1207 = vst.msk [vmem:[%s336_s25] sm:$0xff] %vm371_vm1, %v1206_v0 }
 0x90d   : > { %1582 = shalt.err (!%p1579_p3)
}
 0x90e   : > { %s1583_s14 = scalar_lea.hbm %s1220_s22, 128  ;;  %s1587_s25 = scalar_lea.hbm %s1976_s9, 256 }
 0x90f   : > { %p1584_p4 = scmp.ne.s32.totalorder %s1220_s22, %s1583_s14  ;;  %p1588_p9 = scmp.lt.s32.totalorder %s1220_s22, %s1976_s9 }
 0x910   : > { %p1589_p10 = scmp.lt.s32.totalorder %s1587_s25, %s1583_s14 }
 0x911   : > { %p1585_p7 = pnand %p1584_p4, %p1736_p5 }
 0x912   : > { %p1590_p11 = por %p1589_p10, %p1588_p9 }
 0x913   : > { %p1586_p8 = pneg %p1585_p7 }
 0x915   : > { %p1591_p12 = pnand %p1590_p11, %p1586_p8 }
 0x917   : > { %1594 = shalt.err (!%p1591_p12)
}
 0x918   : > { %1474 = dma.vmem_to_hbm [thread:$0]  (%p1736_p5), %s1223_s26, 128, %s1220_s22, %s1209_s27  }
 0x919 PF: > { %p1480_p13 = scmp.ge.s32.totalorder %s1629_s12, 2  ;;  %s1234_s28 = sand.u32 1, %s1617_s30  }
 0x91a   : > { %s1235_s29 = scalar_lea.sflag [#allocation5], %s1234_s28 }
 0x91b   : > { %p1477_p0 = pnand %p1480_p13, %p1740_p6 }
 0x91d   : > { %p1478_p1 = pneg %p1477_p0 }
 0x91f   : > { %1612 = dma.done.wait (%p1478_p1), %s1235_s29, 128  }
 0x920   : > { %1614 = vsyncadd (%p1478_p1), %s1235_s29, 4294967168  ;;  %p19_p2 = scmp.ge.s32.totalorder %s1723_s15, 4   ;;  %s1979_s30 = smov %s1621_s10 }
 0x921   : > { %s1980_s10 = smov %s1625_s11  ;;  %s1981_s11 = smov %s1734_s18 }
 0x922   : > { %s1982_s12 = smov %s1723_s15  ;;  %21 = sbr.rel (!%p19_p2) target bundleno = 3 (0x3), region = 94 }
 0x927   :  { %1240 = vsyncpa [#allocation5], 1 }
 0x928   :  { %1242 = vsyncpa [#allocation5 + $0x1], 1 }

</bundles_post_ra>
